<compile_context>
chip_gen: v5e
topology: v5e:2x2
jax: 0.10.0
libtpu: 0.0.40
codegen_flags: <defaults>
</compile_context>

<pallas_src>
import math
import functools

import jax
import jax.numpy as jnp
from jax import lax
from jax.experimental import pallas as pl
from jax.experimental.pallas import tpu as pltpu


def _round_up(x, m):
    return ((x + m - 1) // m) * m


# ----------------------------- Pallas GEMM kernel -----------------------------

def _gemm_bias_kernel(w_ref, b_ref, cols_ref, o_ref):
    # w: (Coutp, K) bf16   b: (Coutp, 1) f32   cols: (1, K, tile_l) bf16
    # o: (1, Coutp, tile_l) f32
    y = jnp.dot(w_ref[...], cols_ref[0], preferred_element_type=jnp.float32)
    o_ref[0] = y + b_ref[...]


def batched_gemm_bias(wmat, bias, cols, *, max_tile_l=2048):
    """out[b] = wmat @ cols[b] + bias[:, None], lane-dense along L.

    wmat : (Cout, K) f32    bias : (Cout,) f32    cols : (B, K, L) f32, L % 128 == 0
    Returns (B, Cout, L) float32.  Operands are streamed to the kernel as bf16
    (mem-bound GEMM -> ~2x less HBM traffic); accumulation stays f32 on the MXU.
    """
    Cout, K = wmat.shape
    B, Kc, L = cols.shape
    assert K == Kc and L % 128 == 0

    Coutp = max(8, _round_up(Cout, 8))
    if Coutp != Cout:
        wmat = jnp.pad(wmat, ((0, Coutp - Cout), (0, 0)))
        bias = jnp.pad(bias, ((0, Coutp - Cout),))

    # Largest 128-multiple tile that divides L and is <= max_tile_l: big tiles
    # amortise the ~0.35us/step overhead (review: 256 -> ~63% of HBM roofline,
    # 1024-2048 -> ~85%+).  The batch grid axis guarantees >= 2 grid steps so
    # both v7x TensorCores get work even when L fits a single tile.
    tile_l = 128
    for cand in range(128, min(L, max_tile_l) + 1, 128):
        if L % cand == 0:
            tile_l = cand
    grid = (B, L // tile_l)

    w_bf = wmat.astype(jnp.bfloat16)
    cols_bf = cols.astype(jnp.bfloat16)      # cast fuses into the cols producer
    bias_f = bias.reshape(Coutp, 1).astype(jnp.float32)

    flops = 2 * B * Coutp * K * L
    bytes_accessed = (B * K * L * 2          # streamed cols (bf16)
                      + Coutp * K * 2        # resident weights (bf16)
                      + B * Coutp * L * 4    # output (f32)
                      + Coutp * 4)           # bias

    out = pl.pallas_call(
        _gemm_bias_kernel,
        out_shape=jax.ShapeDtypeStruct((B, Coutp, L), jnp.float32),
        grid=grid,
        in_specs=[
            pl.BlockSpec((Coutp, K), lambda b, j: (0, 0)),      # weights stay resident
            pl.BlockSpec((Coutp, 1), lambda b, j: (0, 0)),      # bias stays resident
            pl.BlockSpec((1, K, tile_l), lambda b, j: (b, 0, j)),  # stream cols tiles
        ],
        out_specs=pl.BlockSpec((1, Coutp, tile_l), lambda b, j: (b, 0, j)),
        compiler_params=pltpu.CompilerParams(
            dimension_semantics=("parallel", "parallel"),
            # explicit scoped-VMEM budget: > v5e's 16 MiB default, well under
            # v7x's 64 MiB/TC physical VMEM (per-step working set is ~0.5 MiB).
            vmem_limit_bytes=32 * 1024 * 1024),
        cost_estimate=pl.CostEstimate(flops=flops, transcendentals=0,
                                      bytes_accessed=bytes_accessed),
    )(w_bf, bias_f, cols_bf)
    return out[:, :Cout, :]


# ------------------------------- XLA glue -------------------------------------

def _deform_sample_cols(x, offset, mask, ksize, stride, pad, l_pad):
    """Deformable bilinear im2col -> cols (B, Cin*K2, Lp) f32, padded tail zero.

    Row layout is cin*K2 + tap, matching weight.reshape(Cout, Cin*K2); the output
    is produced directly in the layout the Pallas GEMM consumes (no transposes).
    """
    # TODO(synk): the data-dependent bilinear gather of deform_conv2d has no clean
    # vectorised Pallas/TPU gather equivalent; it stays XLA gather glue and only
    # the surrounding GEMM runs as a Pallas kernel.
    B, Cin, H, W = x.shape
    K2 = ksize * ksize
    Hout, Wout = offset.shape[2], offset.shape[3]
    L = Hout * Wout

    off = offset.reshape(B, 2 * K2, L)
    # torchvision per-tap (dy, dx) channel interleave (cannot be exercised by the
    # module's zero-init test; verified against a nonzero-offset reference below).
    off_y = off[:, 0::2]
    off_x = off[:, 1::2]
    m = mask.reshape(B, K2, L)
    if l_pad != L:
        padw = ((0, 0), (0, 0), (0, l_pad - L))
        off_y = jnp.pad(off_y, padw)
        off_x = jnp.pad(off_x, padw)
        m = jnp.pad(m, padw)                 # zero mask -> zero cols in the pad tail

    hh, ww = jnp.meshgrid(jnp.arange(Hout), jnp.arange(Wout), indexing="ij")
    base_y = (hh * stride - pad).reshape(-1).astype(jnp.float32)
    base_x = (ww * stride - pad).reshape(-1).astype(jnp.float32)
    if l_pad != L:
        base_y = jnp.pad(base_y, (0, l_pad - L))
        base_x = jnp.pad(base_x, (0, l_pad - L))
    base_y = base_y.reshape(1, 1, l_pad)
    base_x = base_x.reshape(1, 1, l_pad)
    kh = (jnp.arange(K2) // ksize).reshape(1, K2, 1).astype(jnp.float32)
    kw = (jnp.arange(K2) % ksize).reshape(1, K2, 1).astype(jnp.float32)

    py = base_y + kh + off_y                 # sampling positions (B, K2, Lp)
    px = base_x + kw + off_x
    y0 = jnp.floor(py)
    x0 = jnp.floor(px)
    wy1, wx1 = py - y0, px - x0
    wy0, wx0 = 1.0 - wy1, 1.0 - wx1
    y0i = y0.astype(jnp.int32)
    x0i = x0.astype(jnp.int32)

    x_flat = x.reshape(B, Cin, H * W)        # free reshape; channels stay leading

    def corner(yi, xi, wgt):
        valid = ((yi >= 0) & (yi < H) & (xi >= 0) & (xi < W)).astype(jnp.float32)
        idx = jnp.clip(yi, 0, H - 1) * W + jnp.clip(xi, 0, W - 1)   # (B, K2, Lp)
        gidx = jnp.broadcast_to(idx.reshape(B, 1, K2 * l_pad), (B, Cin, K2 * l_pad))
        g = jnp.take_along_axis(x_flat, gidx, axis=2).reshape(B, Cin, K2, l_pad)
        return g * (wgt * valid).reshape(B, 1, K2, l_pad)

    s = (corner(y0i,     x0i,     wy0 * wx0)
         + corner(y0i,     x0i + 1, wy0 * wx1)
         + corner(y0i + 1, x0i,     wy1 * wx0)
         + corner(y0i + 1, x0i + 1, wy1 * wx1))
    s = s * m.reshape(B, 1, K2, l_pad)       # per-tap modulation mask
    return s.reshape(B, Cin * K2, l_pad)     # free reshape (row = cin*K2 + tap)


def _offset_mask_conv(x, om_w, om_b, stride, padding):
    """conv_offset_mask via XLA's native TPU conv (no im2col HBM round trip)."""
    om = lax.conv_general_dilated(
        x, om_w, window_strides=(stride, stride),
        padding=((padding, padding), (padding, padding)),
        dimension_numbers=("NCHW", "OIHW", "NCHW"),
        precision=lax.Precision.HIGHEST)
    return om + om_b.reshape(1, -1, 1, 1)


# --------------------------- module forward pass -------------------------------

def deformable_conv2d_forward(params, x, *, kernel_size=3, stride=1, padding=1):
    B, Cin, H, W = x.shape
    K2 = kernel_size * kernel_size
    Cout = params["w"].shape[0]

    # 1) conv_offset_mask -> offsets + (sigmoid'd) mask.  Sigmoid only on the K2
    #    mask channels.
    om = _offset_mask_conv(x, params["om_w"], params["om_b"], stride, padding)
    Hout, Wout = om.shape[2], om.shape[3]
    offset = om[:, :2 * K2]                  # torch.cat((o1, o2), dim=1)
    mask = jax.nn.sigmoid(om[:, 2 * K2:])

    # 2) deformable bilinear im2col, emitted in (B, Cin*K2, Lp) GEMM layout.
    L = Hout * Wout
    Lp = _round_up(L, 128)
    cols = _deform_sample_cols(x, offset, mask, kernel_size, stride, padding, Lp)

    # 3) main deformable conv: batched lane-dense Pallas GEMM with fused bias,
    #    output already in (B, Cout, L) layout -> free reshape to NCHW.
    wmat = params["w"].reshape(Cout, Cin * K2)
    out = batched_gemm_bias(wmat, params["b"], cols)
    return out[:, :, :L].reshape(B, Cout, Hout, Wout)


# ------------------------------ parameter init ---------------------------------

def make_params(key, in_channels, out_channels, kernel_size=3):
    # matches DeformableConv2d.reset_parameters / _init_weight
    n = in_channels * kernel_size ** 2
    stdv = 1.0 / math.sqrt(n)
    w = jax.random.uniform(key, (out_channels, in_channels, kernel_size, kernel_size),
                           jnp.float32, minval=-stdv, maxval=stdv)
    b = jnp.zeros((out_channels,), jnp.float32)
    om_w = jnp.zeros((3 * kernel_size ** 2, in_channels, kernel_size, kernel_size),
                     jnp.float32)            # zero-init (module _init_weight)
    om_b = jnp.zeros((3 * kernel_size ** 2,), jnp.float32)
    return {"w": w, "b": b, "om_w": om_w, "om_b": om_b}


# ----------------------------------- main ---------------------------------------

if __name__ == "__main__":
    key = jax.random.PRNGKey(0)
    kp, kx, ko = jax.random.split(key, 3)

    B, Cin, Cout, H, W = 2, 4, 8, 16, 16
    K2 = 9
    params = make_params(kp, Cin, Cout, kernel_size=3)
    x = jax.random.normal(kx, (B, Cin, H, W), jnp.float32)

    fwd = jax.jit(functools.partial(deformable_conv2d_forward,
                                    kernel_size=3, stride=1, padding=1))
    out = jax.block_until_ready(fwd(params, x))
    assert out.shape == (B, Cout, H, W)
    assert bool(jnp.all(jnp.isfinite(out)))

    # --- check 1: zero-init conv_offset_mask => offsets == 0, mask == 0.5, so the
    #     exact result is 0.5*conv2d(x, w) + bias.  The reference uses bf16-rounded
    #     operands (matching the kernel's bf16 streaming) so the tolerance stays tight.
    xb = x.astype(jnp.bfloat16).astype(jnp.float32)
    wb = params["w"].astype(jnp.bfloat16).astype(jnp.float32)
    ref = 0.5 * lax.conv_general_dilated(
        xb, wb, window_strides=(1, 1), padding=((1, 1), (1, 1)),
        dimension_numbers=("NCHW", "OIHW", "NCHW"),
        precision=lax.Precision.HIGHEST) + params["b"].reshape(1, -1, 1, 1)
    err = float(jnp.max(jnp.abs(out - ref)))
    assert err < 1e-3, f"zero-offset mismatch vs reference: {err}"

    # --- check 2: nonzero offsets/mask, against a pure-JAX (einsum) reference of the
    #     same sampling math -> validates the Pallas GEMM, layouts and bias fusion
    #     with nontrivial data.
    params2 = dict(params)
    params2["om_w"] = 0.3 * jax.random.normal(ko, params["om_w"].shape, jnp.float32)
    params2["om_b"] = 0.05 * jnp.ones_like(params["om_b"])
    out2 = jax.block_until_ready(fwd(params2, x))
    assert bool(jnp.all(jnp.isfinite(out2)))

    om_r = _offset_mask_conv(x, params2["om_w"], params2["om_b"], 1, 1)
    off_r = om_r[:, :2 * K2]
    msk_r = jax.nn.sigmoid(om_r[:, 2 * K2:])
    cols_r = _deform_sample_cols(x, off_r, msk_r, 3, 1, 1, H * W)
    cols_rb = cols_r.astype(jnp.bfloat16).astype(jnp.float32)
    wmat_rb = params2["w"].reshape(Cout, Cin * K2).astype(jnp.bfloat16).astype(jnp.float32)
    ref2 = jnp.einsum("ok,bkl->bol", wmat_rb, cols_rb,
                      precision=lax.Precision.HIGHEST) + params2["b"].reshape(1, -1, 1)
    ref2 = ref2.reshape(B, Cout, H, W)
    err2 = float(jnp.max(jnp.abs(out2 - ref2)))
    assert err2 < 5e-3, f"nonzero-offset mismatch vs reference: {err2}"

    print("KERNEL_OK")
</pallas_src>

<mosaic_0001>
module attributes {stable_mosaic.version = 11 : i64} {
  func.func @_gemm_bias_kernel(%arg0: i32, %arg1: i32, %arg2: memref<8x36xbf16, #tpu.memory_space<vmem>>, %arg3: memref<8x1xf32, #tpu.memory_space<vmem>>, %arg4: memref<1x36x256xbf16, #tpu.memory_space<vmem>>, %arg5: memref<1x8x256xf32, #tpu.memory_space<vmem>>) attributes {dimension_semantics = [#tpu.dimension_semantics<parallel>, #tpu.dimension_semantics<parallel>], iteration_bounds = array<i64: 2, 1>, scalar_prefetch = 0 : i64, scratch_operands = 0 : i64, tpu.core_type = #tpu.core_type<tc>, window_params = [{pipeline_mode = #tpu.pipeline_mode<synchronous>, transform_indices = @transform_0, window_bounds = array<i64: 8, 36>}, {pipeline_mode = #tpu.pipeline_mode<synchronous>, transform_indices = @transform_1, window_bounds = array<i64: 8, 1>}, {transform_indices = @transform_2, window_bounds = array<i64: 1, 36, 256>}, {transform_indices = @transform_3, window_bounds = array<i64: 1, 8, 256>}]} {
    %c0 = arith.constant 0 : index
    %c0_0 = arith.constant 0 : index
    %0 = vector.load %arg2[%c0, %c0_0] : memref<8x36xbf16, #tpu.memory_space<vmem>>, vector<8x36xbf16>
    %c0_1 = arith.constant 0 : index
    %c0_2 = arith.constant 0 : index
    %c0_3 = arith.constant 0 : index
    %1 = vector.load %arg4[%c0_1, %c0_2, %c0_3] : memref<1x36x256xbf16, #tpu.memory_space<vmem>>, vector<1x36x256xbf16>
    %2 = vector.shape_cast %1 : vector<1x36x256xbf16> to vector<36x256xbf16>
    %cst = arith.constant dense<0.000000e+00> : vector<8x256xf32>
    %3 = tpu.matmul %0, %2, %cst {dimension_numbers = #tpu.dot_dimension_numbers<[1], [0], [0], [1], [0, 0, 1, 1], [], []>} : vector<8x36xbf16>, vector<36x256xbf16>, vector<8x256xf32> -> vector<8x256xf32>
    %c0_4 = arith.constant 0 : index
    %c0_5 = arith.constant 0 : index
    %4 = vector.load %arg3[%c0_4, %c0_5] : memref<8x1xf32, #tpu.memory_space<vmem>>, vector<8x1xf32>
    %5 = vector.broadcast %4 : vector<8x1xf32> to vector<8x256xf32>
    %6 = arith.addf %3, %5 : vector<8x256xf32>
    %c0_6 = arith.constant 0 : index
    %c0_7 = arith.constant 0 : index
    %c0_8 = arith.constant 0 : index
    %7 = vector.load %arg5[%c0_6, %c0_7, %c0_8] : memref<1x8x256xf32, #tpu.memory_space<vmem>>, vector<1x8x256xf32>
    %8 = vector.shape_cast %7 : vector<1x8x256xf32> to vector<8x256xf32>
    %9 = vector.shape_cast %6 : vector<8x256xf32> to vector<1x8x256xf32>
    tpu.vector_store %arg5[%c0_6, %c0_7, %c0_8], %9 {strides = array<i32>} : memref<1x8x256xf32, #tpu.memory_space<vmem>>, vector<1x8x256xf32>,
    return
  }
  func.func @transform_0(%arg0: i32, %arg1: i32) -> (i32, i32) {
    %c0_i32 = arith.constant 0 : i32
    %c0_i32_0 = arith.constant 0 : i32
    %c0_i32_1 = arith.constant 0 : i32
    return %c0_i32, %c0_i32_0 : i32, i32
  }
  func.func @transform_1(%arg0: i32, %arg1: i32) -> (i32, i32) {
    %c0_i32 = arith.constant 0 : i32
    %c0_i32_0 = arith.constant 0 : i32
    %c0_i32_1 = arith.constant 0 : i32
    return %c0_i32, %c0_i32_0 : i32, i32
  }
  func.func @transform_2(%arg0: i32, %arg1: i32) -> (i32, i32, i32) {
    %c0_i32 = arith.constant 0 : i32
    %c0_i32_0 = arith.constant 0 : i32
    return %arg0, %c0_i32, %arg1 : i32, i32, i32
  }
  func.func @transform_3(%arg0: i32, %arg1: i32) -> (i32, i32, i32) {
    %c0_i32 = arith.constant 0 : i32
    %c0_i32_0 = arith.constant 0 : i32
    return %arg0, %c0_i32, %arg1 : i32, i32, i32
  }
}

</mosaic_0001>

<bundles_post_ra>
// kernel: deformable_conv2d_forward.1
= control target key start
LH: loop header
LB: loop body
LE: loop exit
PB: predicated region body
PF: predicated region fallthrough
CT: control target
= control target key end

     0   :  { %s479_s12 = smov 0   ;;  %s481_s13 = smov 0   ;;  %s522_s0 = inlined_call_operand.vmem [shape: bf16[8,36], index: 0, kind: input, shape index: {}]   ;;  %s523_s1 = inlined_call_operand.vmem [shape: f32[8,1], index: 1, kind: input, shape index: {}]   ;;  %s524_s2 = inlined_call_operand.vmem [shape: bf16[2,36,256], index: 2, kind: input, shape index: {}]   ;;  %s525_s3 = inlined_call_operand.vmem [shape: f32[2,8,256], index: 3, kind: output, shape index: {}]  }
   0x1   :  { %s483_s14 = smov 0  }
   0x2 LB: > { %s25_s15 = sadd.s32 1, %s452_s13  ;;  %p378_p0 = scmp.ge.s32.totalorder %s456_s14, 1  ;;  %s456_s14 = sphi %s483_s14, %s13_s14   ;;  %s452_s13 = sphi %s481_s13, %s527_s13   ;;  %s448_s12 = sphi %s479_s12, %s526_s12  }
   0x3   : > { %p27_p1 = scmp.ge.s32.totalorder %s25_s15, 2  ;;  %p158_p2 = scmp.lt.s32.totalorder %s456_s14, 3 }
   0x5   : > { %s529_s15 = smov (%p27_p1, %s25_s15), 0  ;;  %p159_p3 = pnand %p378_p0, %p158_p2 }
   0x6   : > { %p191_p4 = scmp.lt.s32.totalorder (!%p159_p3), %s448_s12, 1 }
   0x7   : > { %162 = sbr.rel (%p159_p3) target bundleno = 167 (0xa7), region = 32 }
   0xc   : > { %v458_v0 = vmov 0   ;;  %v217_v1 = vld [vmem:[%s523_s1] sm:$0xff]  ;;  %s531_s12 = smov (!%p191_p4, %s448_s12), 1  ;;  %vm252_vm0 = vcmask 1041408   ;;  %vm248_vm1 = vcmask 293888  }
   0xd   : > { %433 = vset.pattern.permute.xlu0 %v458_v0  ;;  %s407_s18 = smul.u32 40, %s531_s12  ;;  %v211_v21 = vld [vmem:[%s522_s0] sm:$0xf]  ;;  %s402_s24 = sshll.u32 %s531_s12, 4 }
   0xe   : > { %220 = vperm.xlu0 %433, %v217_v1   ;;  %s208_s27 = scalar_lea.vmem %s525_s3, %s402_s24 }
   0xf   : > { %s198_s21 = scalar_lea.vmem %s524_s2, %s407_s18 }
  0x10   : > { %v216_v2 = vld [vmem:[%s198_s21 + $0x20] sm:$0x33]  ;;  %v392_v5 = vld [vmem:[%s198_s21 + $0x10] sm:$0xf]  ;;  %v406_v8 = vld [vmem:[%s198_s21 + $0x14] sm:$0xf0] }
  0x11   : > { %v236_v3 = vunpack.c.l.b16 %v216_v2  ;;  %v237_v4 = vunpack.c.h.b16 %v216_v2  ;;  %v405_v9 = vld [vmem:[%s198_s21 + $0x14] sm:$0xf]  ;;  %v394_v10 = vld [vmem:[%s198_s21 + $0x18] sm:$0xf0]  ;;  %v393_v13 = vor.u32 %v406_v8, %v392_v5  ;;  %v384_v15 = vld [vmem:[%s198_s21] sm:$0xf] }
  0x12   : > { %v397_v14 = vor.u32 %v405_v9, %v394_v10  ;;  %v404_v16 = vld [vmem:[%s198_s21 + $0x4] sm:$0xf0]  ;;  %v403_v17 = vld [vmem:[%s198_s21 + $0x4] sm:$0xf]  ;;  %v386_v18 = vld [vmem:[%s198_s21 + $0x8] sm:$0xf0] }
  0x13   : > { %v242_v6 = vpack.c.b16 %v236_v3, %v236_v3  ;;  %v243_v7 = vpack.c.b16 %v237_v4, %v237_v4  ;;  %v385_v19 = vor.u32 %v404_v16, %v384_v15  ;;  %v389_v20 = vor.u32 %v403_v17, %v386_v18 }
  0x15   : > { %v254_v11 = vsel %vm252_vm0, %v242_v6, 0  ;;  %v257_v12 = vsel %vm252_vm0, %v243_v7, 0 }
  0x16   : > { %264 = vmatpush.bf16.msra.mxu0 %v254_v11  ;;  %277 = vmatpush.bf16.msra.mxu1 %v257_v12 }
  0x1a   : > { %265 = vmatpush.bf16.msra.mxu0 %v393_v13  ;;  %278 = vmatpush.bf16.msra.mxu1 %v397_v14 }
  0x1e   : > { %266 = vmatpush.bf16.msra.mxu0 %v385_v19  ;;  %279 = vmatpush.bf16.msra.mxu1 %v389_v20 }
  0x21   : > { %398 = vmatmul.msk.bf16.vlgmr.msra.gmra.mxu0 %vm248_vm1, %v211_v21  ;;  %399 = vmatmul.msk.bf16.vlgmr.msra.gmra.mxu1 %vm248_vm1, %v211_v21 }
  0x80   : > { %v221_v22 = vpop.permute.xlu0 %220 }
  0x9e   : > { %v268_v23 = vpop.f32.mrf.mxu0  ;;  %v281_v24 = vpop.f32.mrf.mxu1 }
  0x9f   : > { %v269_v25 = vadd.f32 %v268_v23, %v221_v22  ;;  %v282_v26 = vadd.f32 %v281_v24, %v221_v22 }
  0xa1   : > { %285 = vst [vmem:[%s208_s27] sm:$0xff] %v269_v25 }
  0xa2   : > { %286 = vst [vmem:[%s208_s27 + $0x8] sm:$0xff] %v282_v26 }
  0xa6   : > { %v270_v27 = vpop.f32.mrf.mxu0  ;;  %v283_v28 = vpop.f32.mrf.mxu1 }
  0xa7 PF: > { %s13_s14 = sadd.s32 1, %s456_s14   ;;  %s526_s12 = smov %s452_s13 }
  0xa8   : > { %p10_p5 = scmp.ge.s32.totalorder %s13_s14, 4   ;;  %s527_s13 = smov %s529_s15 }
  0xaa   :  { %12 = sbr.rel (!%p10_p5) target bundleno = 2 (0x2), region = 62 }

</bundles_post_ra>
